<compile_context>
chip_gen: v7x
topology: tpu7x:2x2x1
jax: 0.10.0
libtpu: 0.0.40
codegen_flags: <defaults>
</compile_context>

<pallas_src>
import jax
import jax.numpy as jnp
from jax.experimental import pallas as pl
from jax.experimental.pallas import tpu as pltpu

_LANE = 128            # TPU lane width
_W = 8                 # linear2 in/out width (fixed by the module)
_GROUPS = _LANE // _W  # 16 groups of 8 lanes per 128-lane chunk


# ------------------------------ Pallas kernel -------------------------------

def _fused_conv_relu_linear_kernel(x_ref, wc_ref, bc_ref, w2t_ref, b2_ref, o_ref):
    # x_ref:   (bn, 3*HWp)   bn batch rows, channels concatenated along lanes
    # wc_ref:  (8, 3)        conv weight [c_out, c_in]
    # bc_ref:  (8, 1)        conv bias (broadcast across lanes)
    # w2t_ref: (128, 128)    kron(I_16, W2^T): one reusable block-diagonal tile
    # b2_ref:  (1, 128)      l2 bias tiled 16x (lane layout h*8 + j)
    # o_ref:   (bn*8, HWp)   row = b*8 + c_out, lane = h*8 + j
    bn = x_ref.shape[0]
    hwp = o_ref.shape[1]

    x = x_ref[...]                        # (bn, 3*hwp)
    wc = wc_ref[...]                      # (8, 3)

    # 1x1 conv over channels (K=3): three broadcast FMAs on the VPU.
    v = (x[:, 0 * hwp:1 * hwp][:, None, :] * wc[:, 0:1][None, :, :]
         + x[:, 1 * hwp:2 * hwp][:, None, :] * wc[:, 1:2][None, :, :]
         + x[:, 2 * hwp:3 * hwp][:, None, :] * wc[:, 2:3][None, :, :])  # (bn,8,hwp)

    # bias + ReLU epilogue, still in vregs/VMEM.
    v = jnp.maximum(v + bc_ref[...][None, :, :], 0.0)

    # Collapse (bn, 8) -> rows so the MXU sees M = 8*bn (layout no-op: the
    # inner dim is exactly one 8-sublane tile).
    v2 = v.reshape(bn * 8, hwp)

    w2t = w2t_ref[...]
    b2 = b2_ref[...]

    # Linear(8, 8) over the W axis: the full block-diagonal matrix is
    # kron(I_H, W2^T); every 128-aligned diagonal tile equals kron(I_16, W2^T),
    # so one (M,128)@(128,128) MXU matmul per 128-lane chunk (static unroll).
    for k in range(hwp // _LANE):
        lo = k * _LANE
        y = jnp.dot(v2[:, lo:lo + _LANE], w2t,
                    preferred_element_type=jnp.float32,
                    precision=jax.lax.Precision.HIGHEST)
        o_ref[:, lo:lo + _LANE] = y + b2


# ------------------------------ Model wrapper -------------------------------

def init_params(key):
    k1, k2, k3, k4, k5, k6 = jax.random.split(key, 6)
    return {
        # Linear(3, 64) -- created for parity with __init__, unused (see TODO).
        "l1_w": jax.random.normal(k1, (64, 3), jnp.float32) * 0.1,
        "l1_b": jax.random.normal(k2, (64,), jnp.float32) * 0.1,
        # Conv2d(3, 8, kernel_size=1, stride=1): weight (8, 3, 1, 1), bias (8,)
        "conv_w": jax.random.normal(k3, (8, 3, 1, 1), jnp.float32) * 0.1,
        "conv_b": jax.random.normal(k4, (8,), jnp.float32) * 0.1,
        # Linear(8, 8): weight (8, 8), bias (8,)
        "l2_w": jax.random.normal(k5, (8, 8), jnp.float32) * 0.1,
        "l2_b": jax.random.normal(k6, (8,), jnp.float32) * 0.1,
    }


def pack_params(params):
    """Kernel-ready constant weights, built ONCE (hoisted plumbing)."""
    return {
        "wc": params["conv_w"].reshape(8, 3),
        "bc": params["conv_b"].reshape(8, 1),
        # Fixed 128x128 diagonal tile of kron(I_H, W2^T) == kron(I_16, W2^T).
        "w2t": jnp.kron(jnp.eye(_GROUPS, dtype=jnp.float32), params["l2_w"].T),
        "b2t": jnp.tile(params["l2_b"], _GROUPS).reshape(1, _LANE),
    }


def _pick_block_n(n):
    # Batch rows per grid step. Multiple of 8 so the (bn, 3*HWp) input block
    # and (bn*8, HWp) output block are sublane-dense, and MXU M = 8*bn fills
    # 64..256 rows. Keep >= 2 grid steps when the batch allows it so the
    # "parallel" axis can shard across v7x's two TensorCores.
    groups = pl.cdiv(n, 8)
    if groups <= 1:
        return 8
    return 8 * min(4, max(1, groups // 2))


def model_forward(x_nchw, packed):
    N, C, H, W = x_nchw.shape
    assert C == 3 and W == _W, "requires NCHW input with C=3 (conv) and W=8 (linear2)"
    HW = H * W
    HWp = pl.cdiv(HW, _LANE) * _LANE      # pad lanes to a multiple of 128
    bn = _pick_block_n(N)
    Np = pl.cdiv(N, bn) * bn              # pad batch to a multiple of bn

    # Free contiguous collapse; pads only materialize when shapes need them.
    x_flat = x_nchw.reshape(N, C, HW)
    if HWp != HW:
        x_flat = jnp.pad(x_flat, ((0, 0), (0, 0), (0, HWp - HW)))
    if Np != N:
        x_flat = jnp.pad(x_flat, ((0, Np - N), (0, 0), (0, 0)))
    x2d = x_flat.reshape(Np, C * HWp)

    out2d = pl.pallas_call(
        _fused_conv_relu_linear_kernel,
        out_shape=jax.ShapeDtypeStruct((Np * 8, HWp), jnp.float32),
        grid=(Np // bn,),
        in_specs=[
            pl.BlockSpec((bn, C * HWp), lambda n: (n, 0)),
            pl.BlockSpec((8, 3), lambda n: (0, 0)),
            pl.BlockSpec((8, 1), lambda n: (0, 0)),
            pl.BlockSpec((_LANE, _LANE), lambda n: (0, 0)),
            pl.BlockSpec((1, _LANE), lambda n: (0, 0)),
        ],
        out_specs=pl.BlockSpec((bn * 8, HWp), lambda n: (n, 0)),
        compiler_params=pltpu.CompilerParams(
            dimension_semantics=("parallel",)),
    )(x2d, packed["wc"], packed["bc"], packed["w2t"], packed["b2t"])

    # row = b*8 + c_out, lane = h*8 + j  ==>  reshape + (no-op when aligned)
    # slices back to NCHW.
    return out2d.reshape(Np, 8, HWp)[:N, :, :HW].reshape(N, 8, H, W)


def _reference(x_nchw, params):
    # pure-JAX reference of conv(1x1) -> relu -> linear2 (over last dim)
    wc = params["conv_w"].reshape(8, 3)
    v2 = jnp.einsum("nchw,oc->nohw", x_nchw, wc,
                    precision=jax.lax.Precision.HIGHEST) \
        + params["conv_b"][None, :, None, None]
    v3 = jnp.maximum(v2, 0.0)
    v4 = jnp.einsum("nchw,jw->nchj", v3, params["l2_w"],
                    precision=jax.lax.Precision.HIGHEST) + params["l2_b"]
    return v4


if __name__ == "__main__":
    key = jax.random.PRNGKey(0)
    kx, kp = jax.random.split(key)

    # NCHW input: batch=4, channels=3 (conv in), H=16, W=8 (linear2 in).
    # H chosen so H*W = 128 -> exactly one full 128-lane chunk per output row.
    x = jax.random.uniform(kx, (4, 3, 16, 8), dtype=jnp.float32)
    params = init_params(kp)
    packed = pack_params(params)          # constant plumbing built once

    fwd = jax.jit(model_forward)
    out = jax.block_until_ready(fwd(x, packed))

    ref = _reference(x, params)
    assert out.shape == (4, 8, 16, 8)
    assert jnp.allclose(out, ref, atol=1e-4, rtol=1e-4)

    print("KERNEL_OK")
</pallas_src>

<mosaic_0001>
module attributes {stable_mosaic.version = 11 : i64} {
  func.func @_fused_conv_relu_linear_kernel(%arg0: i32, %arg1: memref<8x384xf32, #tpu.memory_space<vmem>>, %arg2: memref<8x3xf32, #tpu.memory_space<vmem>>, %arg3: memref<8x1xf32, #tpu.memory_space<vmem>>, %arg4: memref<128x128xf32, #tpu.memory_space<vmem>>, %arg5: memref<1x128xf32, #tpu.memory_space<vmem>>, %arg6: memref<64x128xf32, #tpu.memory_space<vmem>>) attributes {dimension_semantics = [#tpu.dimension_semantics<parallel>], iteration_bounds = array<i64: 1>, scalar_prefetch = 0 : i64, scratch_operands = 0 : i64, tpu.core_type = #tpu.core_type<tc>, window_params = [{transform_indices = @transform_0, window_bounds = array<i64: 8, 384>}, {pipeline_mode = #tpu.pipeline_mode<synchronous>, transform_indices = @transform_1, window_bounds = array<i64: 8, 3>}, {pipeline_mode = #tpu.pipeline_mode<synchronous>, transform_indices = @transform_2, window_bounds = array<i64: 8, 1>}, {pipeline_mode = #tpu.pipeline_mode<synchronous>, transform_indices = @transform_3, window_bounds = array<i64: 128, 128>}, {pipeline_mode = #tpu.pipeline_mode<synchronous>, transform_indices = @transform_4, window_bounds = array<i64: 1, 128>}, {transform_indices = @transform_5, window_bounds = array<i64: 64, 128>}]} {
    %c0 = arith.constant 0 : index
    %c0_0 = arith.constant 0 : index
    %0 = vector.load %arg1[%c0, %c0_0] : memref<8x384xf32, #tpu.memory_space<vmem>>, vector<8x384xf32>
    %c0_1 = arith.constant 0 : index
    %c0_2 = arith.constant 0 : index
    %1 = vector.load %arg2[%c0_1, %c0_2] : memref<8x3xf32, #tpu.memory_space<vmem>>, vector<8x3xf32>
    %2 = vector.extract_strided_slice %0 {offsets = [0, 0], sizes = [8, 128], strides = [1, 1]} : vector<8x384xf32> to vector<8x128xf32>
    %3 = vector.shape_cast %2 : vector<8x128xf32> to vector<8x1x128xf32>
    %4 = vector.extract_strided_slice %1 {offsets = [0, 0], sizes = [8, 1], strides = [1, 1]} : vector<8x3xf32> to vector<8x1xf32>
    %5 = vector.shape_cast %4 : vector<8x1xf32> to vector<1x8x1xf32>
    %6 = vector.broadcast %3 : vector<8x1x128xf32> to vector<8x8x128xf32>
    %7 = vector.broadcast %5 : vector<1x8x1xf32> to vector<8x8x128xf32>
    %8 = arith.mulf %6, %7 : vector<8x8x128xf32>
    %9 = vector.extract_strided_slice %0 {offsets = [0, 128], sizes = [8, 128], strides = [1, 1]} : vector<8x384xf32> to vector<8x128xf32>
    %10 = vector.shape_cast %9 : vector<8x128xf32> to vector<8x1x128xf32>
    %11 = vector.extract_strided_slice %1 {offsets = [0, 1], sizes = [8, 1], strides = [1, 1]} : vector<8x3xf32> to vector<8x1xf32>
    %12 = vector.shape_cast %11 : vector<8x1xf32> to vector<1x8x1xf32>
    %13 = vector.broadcast %10 : vector<8x1x128xf32> to vector<8x8x128xf32>
    %14 = vector.broadcast %12 : vector<1x8x1xf32> to vector<8x8x128xf32>
    %15 = arith.mulf %13, %14 : vector<8x8x128xf32>
    %16 = arith.addf %8, %15 : vector<8x8x128xf32>
    %17 = vector.extract_strided_slice %0 {offsets = [0, 256], sizes = [8, 128], strides = [1, 1]} : vector<8x384xf32> to vector<8x128xf32>
    %18 = vector.shape_cast %17 : vector<8x128xf32> to vector<8x1x128xf32>
    %19 = vector.extract_strided_slice %1 {offsets = [0, 2], sizes = [8, 1], strides = [1, 1]} : vector<8x3xf32> to vector<8x1xf32>
    %20 = vector.shape_cast %19 : vector<8x1xf32> to vector<1x8x1xf32>
    %21 = vector.broadcast %18 : vector<8x1x128xf32> to vector<8x8x128xf32>
    %22 = vector.broadcast %20 : vector<1x8x1xf32> to vector<8x8x128xf32>
    %23 = arith.mulf %21, %22 : vector<8x8x128xf32>
    %24 = arith.addf %16, %23 : vector<8x8x128xf32>
    %c0_3 = arith.constant 0 : index
    %c0_4 = arith.constant 0 : index
    %25 = vector.load %arg3[%c0_3, %c0_4] : memref<8x1xf32, #tpu.memory_space<vmem>>, vector<8x1xf32>
    %26 = vector.shape_cast %25 : vector<8x1xf32> to vector<1x8x1xf32>
    %27 = vector.broadcast %26 : vector<1x8x1xf32> to vector<8x8x128xf32>
    %28 = arith.addf %24, %27 : vector<8x8x128xf32>
    %cst = arith.constant 0.000000e+00 : f32
    %29 = vector.broadcast %cst : f32 to vector<8x8x128xf32>
    %30 = arith.maximumf %28, %29 : vector<8x8x128xf32>
    %31 = vector.shape_cast %30 : vector<8x8x128xf32> to vector<64x128xf32>
    %c0_5 = arith.constant 0 : index
    %c0_6 = arith.constant 0 : index
    %32 = vector.load %arg4[%c0_5, %c0_6] : memref<128x128xf32, #tpu.memory_space<vmem>>, vector<128x128xf32>
    %c0_7 = arith.constant 0 : index
    %c0_8 = arith.constant 0 : index
    %33 = vector.load %arg5[%c0_7, %c0_8] : memref<1x128xf32, #tpu.memory_space<vmem>>, vector<1x128xf32>
    %cst_9 = arith.constant dense<0.000000e+00> : vector<64x128xf32>
    %34 = tpu.matmul %31, %32, %cst_9 {dimension_numbers = #tpu.dot_dimension_numbers<[1], [0], [0], [1], [0, 0, 1, 1], [], []>, precision = #tpu.contract_precision<fp32>} : vector<64x128xf32>, vector<128x128xf32>, vector<64x128xf32> -> vector<64x128xf32>
    %35 = vector.broadcast %33 : vector<1x128xf32> to vector<64x128xf32>
    %36 = arith.addf %34, %35 : vector<64x128xf32>
    %c0_10 = arith.constant 0 : index
    %c0_11 = arith.constant 0 : index
    %37 = vector.load %arg6[%c0_10, %c0_11] : memref<64x128xf32, #tpu.memory_space<vmem>>, vector<64x128xf32>
    tpu.vector_store %arg6[%c0_10, %c0_11], %36 {strides = array<i32>} : memref<64x128xf32, #tpu.memory_space<vmem>>, vector<64x128xf32>,
    return
  }
  func.func @transform_0(%arg0: i32) -> (i32, i32) {
    %c0_i32 = arith.constant 0 : i32
    %c0_i32_0 = arith.constant 0 : i32
    return %arg0, %c0_i32 : i32, i32
  }
  func.func @transform_1(%arg0: i32) -> (i32, i32) {
    %c0_i32 = arith.constant 0 : i32
    %c0_i32_0 = arith.constant 0 : i32
    %c0_i32_1 = arith.constant 0 : i32
    return %c0_i32, %c0_i32_0 : i32, i32
  }
  func.func @transform_2(%arg0: i32) -> (i32, i32) {
    %c0_i32 = arith.constant 0 : i32
    %c0_i32_0 = arith.constant 0 : i32
    %c0_i32_1 = arith.constant 0 : i32
    return %c0_i32, %c0_i32_0 : i32, i32
  }
  func.func @transform_3(%arg0: i32) -> (i32, i32) {
    %c0_i32 = arith.constant 0 : i32
    %c0_i32_0 = arith.constant 0 : i32
    %c0_i32_1 = arith.constant 0 : i32
    return %c0_i32, %c0_i32_0 : i32, i32
  }
  func.func @transform_4(%arg0: i32) -> (i32, i32) {
    %c0_i32 = arith.constant 0 : i32
    %c0_i32_0 = arith.constant 0 : i32
    %c0_i32_1 = arith.constant 0 : i32
    return %c0_i32, %c0_i32_0 : i32, i32
  }
  func.func @transform_5(%arg0: i32) -> (i32, i32) {
    %c0_i32 = arith.constant 0 : i32
    %c0_i32_0 = arith.constant 0 : i32
    return %arg0, %c0_i32 : i32, i32
  }
}

</mosaic_0001>

<bundles_post_ra>
// kernel: model_forward.1
= control target key start
LH: loop header
LB: loop body
LE: loop exit
PB: predicated region body
PF: predicated region fallthrough
CT: control target
= control target key end

     0   :  { %v2007_v0 = vmov 0   ;;  %v2008_v2 = vmov 2   ;;  %v2009_v15 = vmov 1   ;;  %s2561_s1 = inlined_call_operand.vmem [shape: f32[8,3], index: 1, kind: input, shape index: {}]   ;;  %s2562_s3 = inlined_call_operand.vmem [shape: f32[128,128], index: 3, kind: input, shape index: {}]   ;;  %s2563_s2 = inlined_call_operand.vmem [shape: f32[8,1], index: 2, kind: input, shape index: {}]   ;;  %s2564_s0 = inlined_call_operand.vmem [shape: f32[8,384], index: 0, kind: input, shape index: {}]   ;;  %s2565_s4 = inlined_call_operand.vmem [shape: f32[1,128], index: 4, kind: input, shape index: {}]   ;;  %s2566_s5 = inlined_call_operand.vmem [shape: f32[64,128], index: 5, kind: output, shape index: {}]  }
   0x1   :  { %1999 = vset.pattern.permute.xlu0 %v2007_v0  ;;  %v23_v1 = vld [vmem:[%s2561_s1] sm:$0xff]  ;;  %2001 = vset.pattern.permute.xlu1 %v2008_v2  ;;  %v370_v4 = vld [vmem:[%s2562_s3 + $0x8] sm:$0xff]  ;;  %v371_v6 = vld [vmem:[%s2562_s3 + $0x10] sm:$0xff] }
   0x2   :  { %v369_v3 = vld [vmem:[%s2562_s3] sm:$0xff]  ;;  %116 = vperm.xlu0 %1999, %v23_v1   ;;  %328 = vperm.xlu1 %2001, %v23_v1   ;;  %v372_v7 = vld [vmem:[%s2562_s3 + $0x18] sm:$0xff]  ;;  %v396_v8 = vand.u32 4294901760, %v370_v4  ;;  %v399_v9 = vand.u32 4294901760, %v371_v6  ;;  %v2064_v12 = vld [vmem:[%s2562_s3 + $0x28] sm:$0xff] }
   0x3   :  { %v393_v5 = vand.u32 4294901760, %v369_v3  ;;  %v402_v10 = vand.u32 4294901760, %v372_v7  ;;  %v2059_v11 = vld [vmem:[%s2562_s3 + $0x20] sm:$0xff]  ;;  %v408_v18 = vand.u32 4294901760, %v2064_v12  ;;  %v2078_v19 = vld [vmem:[%s2562_s3 + $0x30] sm:$0xff]  ;;  %v2083_v20 = vld [vmem:[%s2562_s3 + $0x38] sm:$0xff] }
   0x4   :  { %v347_v13 = vld [vmem:[%s2563_s2] sm:$0xff]  ;;  %v405_v17 = vand.u32 4294901760, %v2059_v11  ;;  %v411_v22 = vand.u32 4294901760, %v2078_v19  ;;  %v414_v23 = vand.u32 4294901760, %v2083_v20  ;;  %v2107_v25 = vld [vmem:[%s2562_s3 + $0x48] sm:$0xff]  ;;  %v2124_v29 = vld [vmem:[%s2562_s3 + $0x50] sm:$0xff]  ;;  %v2155_v37 = vsub.f32 %v370_v4, %v396_v8 }
   0x5   :  { %v2069_v14 = vpack.c.bf16 %v396_v8, %v393_v5  ;;  %v2071_v16 = vpack.c.bf16 %v402_v10, %v399_v9  ;;  %v2102_v24 = vld [vmem:[%s2562_s3 + $0x40] sm:$0xff]  ;;  %v420_v28 = vand.u32 4294901760, %v2107_v25  ;;  %v2129_v30 = vld [vmem:[%s2562_s3 + $0x58] sm:$0xff]  ;;  %v423_v32 = vand.u32 4294901760, %v2124_v29  ;;  %v2153_v36 = vld [vmem:[%s2562_s3 + $0x68] sm:$0xff] }
   0x6   :  { %2000 = vset.pattern.permute.xlu0 %v2009_v15  ;;  %2002 = vset.pattern.permute.xlu1 %v2007_v0  ;;  %v2095_v21 = vpack.c.bf16 %v408_v18, %v405_v17  ;;  %v2117_v26 = vpack.c.bf16 %v414_v23, %v411_v22  ;;  %v417_v27 = vand.u32 4294901760, %v2102_v24  ;;  %v426_v33 = vand.u32 4294901760, %v2129_v30  ;;  %v2146_v34 = vld [vmem:[%s2562_s3 + $0x60] sm:$0xff]  ;;  %v2172_v41 = vld [vmem:[%s2562_s3 + $0x70] sm:$0xff]  ;;  %v2177_v42 = vld [vmem:[%s2562_s3 + $0x78] sm:$0xff] }
   0x7   :  { %2589 = vst [vmem:[#allocation2_spill] sm:$0xff] %v2071_v16  ;;  %218 = vperm.xlu0 %2000, %v23_v1   ;;  %350 = vperm.xlu1 %2002, %v347_v13   ;;  %v2148_v35 = vsub.f32 %v369_v3, %v393_v5  ;;  %v429_v38 = vand.u32 4294901760, %v2146_v34  ;;  %v432_v40 = vand.u32 4294901760, %v2153_v36  ;;  %v563_v44 = vand.u32 4294901760, %v2155_v37 }
   0x8   :  { %1852 = vmatprep.subr.bf16.mxu0 %v2069_v14  ;;  %1756 = vmatprep.subr.bf16.mxu1 %v2069_v14  ;;  %2590 = vst [vmem:[#allocation3_spill] sm:$0xff] %v2095_v21  ;;  %2591 = vst [vmem:[#allocation4_spill] sm:$0xff] %v2117_v26  ;;  %v2139_v31 = vpack.c.bf16 %v420_v28, %v417_v27  ;;  %v2166_v39 = vpack.c.bf16 %v426_v33, %v423_v32  ;;  %v435_v47 = vand.u32 4294901760, %v2172_v41 }
   0x9   :  { %1854 = vmatpush3.bf16.msra.mxu0 %v2069_v14  ;;  %1758 = vmatpush3.bf16.msra.mxu1 %v2069_v14  ;;  %v556_v43 = vand.u32 4294901760, %v2148_v35  ;;  %v2181_v45 = vsub.f32 %v371_v6, %v399_v9  ;;  %v2183_v46 = vsub.f32 %v372_v7, %v402_v10  ;;  %v438_v48 = vand.u32 4294901760, %v2177_v42 }
   0xa   :  { %1856 = vmatprep.subr.bf16.mxu0 %v2071_v16  ;;  %1760 = vmatprep.subr.bf16.mxu1 %v2071_v16  ;;  %2592 = vst [vmem:[#allocation5_spill] sm:$0xff] %v2139_v31  ;;  %2593 = vst [vmem:[#allocation6_spill] sm:$0xff] %v2166_v39  ;;  %v2196_v50 = vpack.c.bf16 %v432_v40, %v429_v38  ;;  %v564_v52 = vsub.f32 %v2155_v37, %v563_v44 }
   0xb   :  { %2003 = vset.pattern.permute.xlu0 %v2007_v0  ;;  %v570_v49 = vand.u32 4294901760, %v2181_v45  ;;  %v557_v51 = vsub.f32 %v2148_v35, %v556_v43  ;;  %v577_v53 = vand.u32 4294901760, %v2183_v46  ;;  %v2205_v55 = vsub.f32 %v2059_v11, %v405_v17 }
   0xc   :  { %2594 = vst [vmem:[#allocation7_spill] sm:$0xff] %v2196_v50  ;;  %v2210_v56 = vsub.f32 %v2064_v12, %v408_v18  ;;  %v2225_v62 = vpack.c.bf16 %v438_v48, %v435_v47  ;;  %v565_v0 = vand.u32 4294901760, %v564_v52  ;;  %v2238_v6 = vsub.f32 %v2078_v19, %v411_v22 }
   0xd   :  { %1858 = vmatpush3.bf16.msra.mxu0 %v2071_v16  ;;  %1762 = vmatpush3.bf16.msra.mxu1 %v2071_v16  ;;  %v571_v54 = vsub.f32 %v2181_v45, %v570_v49  ;;  %v2212_v57 = vpack.c.bf16 %v577_v53, %v570_v49  ;;  %v578_v58 = vsub.f32 %v2183_v46, %v577_v53  ;;  %v584_v60 = vand.u32 4294901760, %v2205_v55 }
   0xe   :  { %1860 = vmatprep.subr.bf16.mxu0 %v2095_v21  ;;  %1764 = vmatprep.subr.bf16.mxu1 %v2095_v21  ;;  %v591_v61 = vand.u32 4294901760, %v2210_v56  ;;  %2595 = vst [vmem:[#allocation8_spill] sm:$0xff] %v2225_v62  ;;  %v558_v63 = vand.u32 4294901760, %v557_v51  ;;  %v2243_v7 = vsub.f32 %v2083_v20, %v414_v23  ;;  %v2247_v8 = vpack.c.bf16 %v563_v44, %v556_v43 }
   0xf   :  { %v572_v59 = vand.u32 4294901760, %v571_v54  ;;  %v579_v1 = vand.u32 4294901760, %v578_v58  ;;  %v585_v4 = vsub.f32 %v2205_v55, %v584_v60  ;;  %v598_v12 = vand.u32 4294901760, %v2238_v6 }
  0x10   :  { %v2227_v2 = vpack.c.bf16 %v591_v61, %v584_v60  ;;  %v592_v5 = vsub.f32 %v2210_v56, %v591_v61  ;;  %v2249_v9 = vpack.c.bf16 %v565_v0, %v558_v63  ;;  %v605_v13 = vand.u32 4294901760, %v2243_v7 }
  0x11   :  { %1862 = vmatpush3.bf16.msra.mxu0 %v2095_v21  ;;  %1766 = vmatpush3.bf16.msra.mxu1 %v2095_v21  ;;  %v2229_v3 = vpack.c.bf16 %v579_v1, %v572_v59  ;;  %v586_v10 = vand.u32 4294901760, %v585_v4  ;;  %v611_v17 = vsub.f32 %v2102_v24, %v417_v27  ;;  %v618_v18 = vsub.f32 %v2107_v25, %v420_v28 }
  0x12   :  { %1864 = vmatprep.subr.bf16.mxu0 %v2117_v26  ;;  %1768 = vmatprep.subr.bf16.mxu1 %v2117_v26  ;;  %v593_v11 = vand.u32 4294901760, %v592_v5  ;;  %v2263_v19 = vpack.c.bf16 %v605_v13, %v598_v12  ;;  %v599_v20 = vsub.f32 %v2238_v6, %v598_v12  ;;  %v606_v22 = vsub.f32 %v2243_v7, %v605_v13 }
  0x13   :  { %v612_v23 = vand.u32 4294901760, %v611_v17  ;;  %v619_v24 = vand.u32 4294901760, %v618_v18  ;;  %v625_v49 = vsub.f32 %v2124_v29, %v423_v32  ;;  %v632_v52 = vsub.f32 %v2129_v30, %v426_v33 }
  0x14   :  { %v2253_v15 = vpack.c.bf16 %v593_v11, %v586_v10  ;;  %v600_v27 = vand.u32 4294901760, %v599_v20  ;;  %v607_v43 = vand.u32 4294901760, %v606_v22  ;;  %v639_v63 = vsub.f32 %v2146_v34, %v429_v38 }
  0x15   :  { %1866 = vmatpush3.bf16.msra.mxu0 %v2117_v26  ;;  %1770 = vmatpush3.bf16.msra.mxu1 %v2117_v26  ;;  %v2269_v44 = vpack.c.bf16 %v619_v24, %v612_v23  ;;  %v613_v25 = vsub.f32 %v611_v17, %v612_v23  ;;  %v620_v28 = vsub.f32 %v618_v18, %v619_v24  ;;  %v626_v58 = vand.u32 4294901760, %v625_v49 }
  0x16   :  { %1868 = vmatprep.subr.bf16.mxu0 %v2139_v31  ;;  %1772 = vmatprep.subr.bf16.mxu1 %v2139_v31  ;;  %v2274_v51 = vpack.c.bf16 %v607_v43, %v600_v27  ;;  %v633_v59 = vand.u32 4294901760, %v632_v52  ;;  %v646_v29 = vsub.f32 %v2153_v36, %v432_v40  ;;  %v640_v30 = vand.u32 4294901760, %v639_v63 }
  0x17   :  { %v614_v53 = vand.u32 4294901760, %v613_v25  ;;  %v621_v54 = vand.u32 4294901760, %v620_v28  ;;  %v627_v61 = vsub.f32 %v625_v49, %v626_v58  ;;  %v653_v12 = vsub.f32 %v2172_v41, %v435_v47 }
  0x18   :  { %v2287_v32 = vpack.c.bf16 %v633_v59, %v626_v58  ;;  %v634_v0 = vsub.f32 %v632_v52, %v633_v59  ;;  %v647_v33 = vand.u32 4294901760, %v646_v29  ;;  %v641_v10 = vsub.f32 %v639_v63, %v640_v30 }
  0x19   :  { %1870 = vmatpush3.bf16.msra.mxu0 %v2139_v31  ;;  %1774 = vmatpush3.bf16.msra.mxu1 %v2139_v31  ;;  %v2279_v60 = vpack.c.bf16 %v621_v54, %v614_v53  ;;  %v628_v1 = vand.u32 4294901760, %v627_v61  ;;  %v660_v36 = vsub.f32 %v2177_v42, %v438_v48  ;;  %v654_v13 = vand.u32 4294901760, %v653_v12 }
  0x1a   :  { %1872 = vmatprep.subr.bf16.mxu0 %v2166_v39  ;;  %1776 = vmatprep.subr.bf16.mxu1 %v2166_v39  ;;  %v635_v4 = vand.u32 4294901760, %v634_v0  ;;  %v2289_v5 = vpack.c.bf16 %v647_v33, %v640_v30  ;;  %v648_v11 = vsub.f32 %v646_v29, %v647_v33  ;;  %v642_v38 = vand.u32 4294901760, %v641_v10 }
  0x1b   :  { %v661_v20 = vand.u32 4294901760, %v660_v36  ;;  %v655_v23 = vsub.f32 %v653_v12, %v654_v13  ;;  %v2307_v41 = vpack.c.bf16 %v2155_v37, %v2148_v35  ;;  %v2311_v42 = vpack.c.bf16 %v2183_v46, %v2181_v45  ;;  %v21_v46 = vld [vmem:[%s2564_s0 + $0x8] sm:$0xff] }
  0x1c   :  { %v2294_v34 = vpack.c.bf16 %v635_v4, %v628_v1  ;;  %v649_v40 = vand.u32 4294901760, %v648_v11  ;;  %v2315_v47 = vpack.c.bf16 %v2210_v56, %v2205_v55  ;;  %v2319_v48 = vpack.c.bf16 %v2243_v7, %v2238_v6  ;;  %v20_v7 = vld [vmem:[%s2564_s0] sm:$0xff] }
  0x1d   :  { %1874 = vmatpush3.bf16.msra.mxu0 %v2166_v39  ;;  %1778 = vmatpush3.bf16.msra.mxu1 %v2166_v39  ;;  %v2301_v24 = vpack.c.bf16 %v661_v20, %v654_v13  ;;  %v662_v27 = vsub.f32 %v660_v36, %v661_v20  ;;  %v656_v43 = vand.u32 4294901760, %v655_v23  ;;  %2596 = vst [vmem:[#allocation9_spill] sm:$0xff] %v2307_v41  ;;  %2597 = vst [vmem:[#allocation10_spill] sm:$0xff] %v2311_v42  ;;  %v2010_v37 = vmov 1966171168  }
  0x1e   :  { %1876 = vmatprep.subr.bf16.mxu0 %v2196_v50  ;;  %1780 = vmatprep.subr.bf16.mxu1 %v2196_v50  ;;  %v2299_v22 = vpack.c.bf16 %v649_v40, %v642_v38  ;;  %2598 = vst [vmem:[#allocation11_spill] sm:$0xff] %v2315_v47  ;;  %2599 = vst [vmem:[#allocation12_spill] sm:$0xff] %v2319_v48  ;;  %v2321_v53 = vpack.c.bf16 %v618_v18, %v611_v17  ;;  %v27_v59 = vunpack.c.l.s4 %v2010_v37  ;;  %v29_v45 = vlaneseq  ;;  %v22_v17 = vld [vmem:[%s2564_s0 + $0x10] sm:$0xff] }
  0x1f   :  { %v663_v25 = vand.u32 4294901760, %v662_v27  ;;  %v2323_v54 = vpack.c.bf16 %v632_v52, %v625_v49  ;;  %v2325_v58 = vpack.c.bf16 %v646_v29, %v639_v63  ;;  %v2327_v35 = vpack.c.bf16 %v660_v36, %v653_v12 }
  0x20   :  { %2600 = vst [vmem:[#allocation13_spill] sm:$0xff] %v2321_v53  ;;  %v28_v55 = vunpack.c.0.s8 %v27_v59  ;;  %v30_v56 = vshrl.u32 %v29_v45, 7  ;;  %v128_v61 = vcombine.high %v21_v46, %v21_v46  ;;  %v25_v52 = vcombine.high %v20_v7, %v20_v7 }
  0x21   :  { %1878 = vmatpush3.bf16.msra.mxu0 %v2196_v50  ;;  %1782 = vmatpush3.bf16.msra.mxu1 %v2196_v50  ;;  %v2303_v28 = vpack.c.bf16 %v663_v25, %v656_v43  ;;  %2601 = vst [vmem:[#allocation14_spill] sm:$0xff] %v2323_v54  ;;  %2602 = vst [vmem:[#allocation15_spill] sm:$0xff] %v2325_v58  ;;  %v238_v63 = vcombine.high %v22_v17, %v22_v17 }
  0x22   :  { %1880 = vmatprep.subr.bf16.mxu0 %v2225_v62  ;;  %1784 = vmatprep.subr.bf16.mxu1 %v2225_v62  ;;  %2603 = vst [vmem:[#allocation16_spill] sm:$0xff] %v2327_v35  ;;  %v31_v6 = vsub.s32 %v28_v55, %v30_v56  ;;  %v2348_v59 = vsub.s32 0, %v30_v56 }
  0x24   :  { %v135_v18 = vrot.slane %v21_v46, %v31_v6  ;;  %v142_v49 = vrot.slane %v128_v61, %v31_v6  ;;  %v32_v29 = vrot.slane %v20_v7, %v31_v6  ;;  %v245_v0 = vrot.slane %v22_v17, %v31_v6 }
  0x25   :  { %1882 = vmatpush3.bf16.msra.mxu0 %v2225_v62  ;;  %1786 = vmatpush3.bf16.msra.mxu1 %v2225_v62  ;;  %v39_v33 = vrot.slane %v25_v52, %v31_v6  ;;  %v252_v4 = vrot.slane %v238_v63, %v31_v6 }
  0x26   :  { %1884 = vmatprep.subr.bf16.mxu0 %v2247_v8  ;;  %1788 = vmatprep.subr.bf16.mxu1 %v2249_v9  ;;  %v143_v1 = vcombine.high %v135_v18, %v135_v18  ;;  %v144_v30 = vcombine.high %v142_v49, %v142_v49  ;;  %v2338_v10 = vrot.slane %v135_v18, %v31_v6 }
  0x27   :  { %v40_v11 = vcombine.high %v32_v29, %v32_v29  ;;  %v253_v12 = vcombine.high %v245_v0, %v245_v0  ;;  %v2340_v36 = vrot.slane %v142_v49, %v31_v6  ;;  %v41_v13 = vcombine.high %v39_v33, %v39_v33 }
  0x28   :  { %v2342_v38 = vrot.slane %v143_v1, %v31_v6  ;;  %v2344_v40 = vrot.slane %v144_v30, %v31_v6  ;;  %v254_v20 = vcombine.high %v252_v4, %v252_v4  ;;  %v173_v23 = vcombine.high %v2338_v10, %v2338_v10 }
  0x29   :  { %v48_v27 = vrot.slane %v32_v29, %v31_v6  ;;  %v261_v43 = vrot.slane %v245_v0, %v31_v6  ;;  %v62_v25 = vrot.slane %v40_v11, %v31_v6  ;;  %v275_v37 = vrot.slane %v253_v12, %v31_v6 }
  0x2a   :  { %v174_v45 = vcombine.high %v2340_v36, %v2340_v36  ;;  %v175_v46 = vcombine.high %v2342_v38, %v2342_v38  ;;  %v176_v55 = vcombine.high %v2344_v40, %v2344_v40  ;;  %v55_v61 = vrot.slane %v39_v33, %v31_v6 }
  0x2b   :  { %v268_v7 = vrot.slane %v252_v4, %v31_v6  ;;  %v69_v17 = vrot.slane %v41_v13, %v31_v6  ;;  %v282_v18 = vrot.slane %v254_v20, %v31_v6  ;;  %v184_v49 = vrot.slane %v2342_v38, %v2348_v59 }
  0x2c   :  { %v188_v52 = vrot.slane %v173_v23, %v2348_v59  ;;  %v196_v56 = vrot.slane %v2340_v36, %v2348_v59  ;;  %v200_v63 = vrot.slane %v2344_v40, %v2348_v59  ;;  %v70_v29 = vcombine.high %v48_v27, %v48_v27 }
  0x2d   :  { %v283_v0 = vcombine.high %v261_v43, %v261_v43  ;;  %v72_v1 = vcombine.high %v62_v25, %v62_v25  ;;  %v285_v30 = vcombine.high %v275_v37, %v275_v37  ;;  %v192_v33 = vrot.slane %v175_v46, %v2348_v59 }
  0x2e   :  { %v204_v4 = vrot.slane %v174_v45, %v2348_v59  ;;  %v208_v6 = vrot.slane %v176_v55, %v2348_v59  ;;  %v180_v11 = vrot.slane %v2338_v10, %v2348_v59  ;;  %v71_v12 = vcombine.high %v55_v61, %v55_v61 }
  0x2f   :  { %v284_v38 = vcombine.high %v268_v7, %v268_v7  ;;  %v73_v13 = vcombine.high %v69_v17, %v69_v17  ;;  %v286_v36 = vcombine.high %v282_v18, %v282_v18  ;;  %v77_v20 = vrot.slane %v48_v27, %v2348_v59 }
  0x30   :  { %v290_v40 = vrot.slane %v261_v43, %v2348_v59  ;;  %v81_v23 = vrot.slane %v62_v25, %v2348_v59  ;;  %v294_v35 = vrot.slane %v275_v37, %v2348_v59  ;;  %v85_v46 = vrot.slane %v70_v29, %v2348_v59 }
  0x31   :  { %v298_v45 = vrot.slane %v283_v0, %v2348_v59  ;;  %v89_v55 = vrot.slane %v72_v1, %v2348_v59  ;;  %v302_v10 = vrot.slane %v285_v30, %v2348_v59  ;;  %v93_v50 = vrot.slane %v55_v61, %v2348_v59 }
  0x32   :  { %v306_v27 = vrot.slane %v268_v7, %v2348_v59  ;;  %v97_v43 = vrot.slane %v69_v17, %v2348_v59  ;;  %v310_v25 = vrot.slane %v282_v18, %v2348_v59  ;;  %v101_v37 = vrot.slane %v71_v12, %v2348_v59 }
  0x33   :  { %v314_v29 = vrot.slane %v284_v38, %v2348_v59  ;;  %v105_v0 = vrot.slane %v73_v13, %v2348_v59  ;;  %v318_v1 = vrot.slane %v286_v36, %v2348_v59 }
  0x81   :  { %v117_v62 = vpop.permute.xlu0 %116  ;;  %v329_v58 = vpop.permute.xlu1 %328 }
  0x82   :  { %v119_v54 = vmul.f32 %v117_v62, %v77_v20  ;;  %v331_v30 = vmul.f32 %v329_v58, %v290_v40  ;;  %v120_v39 = vmul.f32 %v117_v62, %v81_v23  ;;  %v332_v53 = vmul.f32 %v329_v58, %v294_v35 }
  0x83   :  { %v121_v31 = vmul.f32 %v117_v62, %v85_v46  ;;  %v333_v61 = vmul.f32 %v329_v58, %v298_v45  ;;  %v122_v48 = vmul.f32 %v117_v62, %v89_v55  ;;  %v334_v7 = vmul.f32 %v329_v58, %v302_v10 }
  0x84   :  { %v123_v26 = vmul.f32 %v117_v62, %v93_v50  ;;  %v335_v17 = vmul.f32 %v329_v58, %v306_v27  ;;  %v124_v47 = vmul.f32 %v117_v62, %v97_v43  ;;  %v336_v18 = vmul.f32 %v329_v58, %v310_v25 }
  0x85   :  { %v125_v12 = vmul.f32 %v117_v62, %v101_v37  ;;  %v337_v42 = vmul.f32 %v329_v58, %v314_v29  ;;  %v126_v38 = vmul.f32 %v117_v62, %v105_v0  ;;  %v338_v16 = vmul.f32 %v329_v58, %v318_v1 }
  0x86   :  { %v219_v21 = vpop.permute.xlu0 %218  ;;  %v351_v10 = vpop.permute.xlu1 %350 }
  0x87   :  { %v222_v13 = vmul.f32 %v219_v21, %v184_v49  ;;  %v223_v41 = vmul.f32 %v219_v21, %v188_v52  ;;  %v224_v59 = vmul.f32 %v219_v21, %v192_v33  ;;  %v225_v36 = vmul.f32 %v219_v21, %v196_v56 }
  0x88   :  { %v226_v20 = vmul.f32 %v219_v21, %v200_v63  ;;  %v227_v40 = vmul.f32 %v219_v21, %v204_v4  ;;  %v228_v35 = vmul.f32 %v219_v21, %v208_v6  ;;  %v221_v23 = vmul.f32 %v219_v21, %v180_v11 }
  0x89   :  { %v230_v46 = vadd.f32 %v222_v13, %v120_v39  ;;  %v231_v45 = vadd.f32 %v223_v41, %v121_v31  ;;  %v232_v55 = vadd.f32 %v224_v59, %v122_v48  ;;  %v233_v50 = vadd.f32 %v225_v36, %v123_v26 }
  0x8a   :  { %v229_v27 = vadd.f32 %v221_v23, %v119_v54  ;;  %v234_v43 = vadd.f32 %v226_v20, %v124_v47  ;;  %v235_v25 = vadd.f32 %v227_v40, %v125_v12  ;;  %v236_v37 = vadd.f32 %v228_v35, %v126_v38 }
  0x8b   :  { %v340_v29 = vadd.f32 %v332_v53, %v230_v46  ;;  %v341_v62 = vadd.f32 %v333_v61, %v231_v45  ;;  %v342_v58 = vadd.f32 %v334_v7, %v232_v55  ;;  %v343_v49 = vadd.f32 %v335_v17, %v233_v50 }
  0x8c   :  { %v339_v52 = vadd.f32 %v331_v30, %v229_v27  ;;  %v344_v33 = vadd.f32 %v336_v18, %v234_v43  ;;  %v345_v56 = vadd.f32 %v337_v42, %v235_v25  ;;  %v346_v63 = vadd.f32 %v338_v16, %v236_v37 }
  0x8d   :  { %v354_v4 = vadd.f32 %v351_v10, %v340_v29  ;;  %v355_v6 = vadd.f32 %v351_v10, %v341_v62  ;;  %v356_v21 = vadd.f32 %v351_v10, %v342_v58  ;;  %v357_v39 = vadd.f32 %v351_v10, %v343_v49 }
  0x8e   :  { %v353_v31 = vadd.f32 %v351_v10, %v339_v52  ;;  %v358_v41 = vadd.f32 %v351_v10, %v344_v33  ;;  %v359_v26 = vadd.f32 %v351_v10, %v345_v56  ;;  %v360_v48 = vadd.f32 %v351_v10, %v346_v63 }
  0x8f   :  { %v362_v54 = vmax.f32 %v354_v4, 0.0  ;;  %v363_v47 = vmax.f32 %v355_v6, 0.0  ;;  %v364_v11 = vmax.f32 %v356_v21, 0.0  ;;  %v365_v0 = vmax.f32 %v357_v39, 0.0 }
  0x90   :  { %v361_v53 = vmax.f32 %v353_v31, 0.0  ;;  %v366_v1 = vmax.f32 %v358_v41, 0.0  ;;  %v367_v61 = vmax.f32 %v359_v26, 0.0  ;;  %v368_v18 = vmax.f32 %v360_v48, 0.0  ;;  %v2617_v41 = vld [vmem:[#allocation8_spill] sm:$0xff] }
  0x91   :  { %v2384_v7 = vand.u32 4294901760, %v362_v54  ;;  %v2386_v30 = vand.u32 4294901760, %v363_v47  ;;  %v2388_v16 = vand.u32 4294901760, %v364_v11  ;;  %v2390_v42 = vand.u32 4294901760, %v365_v0  ;;  %v2618_v26 = vld [vmem:[#allocation16_spill] sm:$0xff] }
  0x92   :  { %v2392_v17 = vand.u32 4294901760, %v361_v53  ;;  %v2403_v59 = vand.u32 4294901760, %v366_v1  ;;  %v2413_v23 = vand.u32 4294901760, %v367_v61  ;;  %v2421_v10 = vand.u32 4294901760, %v368_v18 }
  0x93   :  { %v2395_v12 = vsub.f32 %v362_v54, %v2384_v7  ;;  %v2398_v38 = vsub.f32 %v363_v47, %v2386_v30  ;;  %v2401_v13 = vsub.f32 %v364_v11, %v2388_v16  ;;  %v2411_v35 = vsub.f32 %v365_v0, %v2390_v42  ;;  %v1346_v47 = vld [vmem:[%s2565_s4] ss:$0 sm:$0xff] }
  0x94   :  { %v2406_v36 = vsub.f32 %v361_v53, %v2392_v17  ;;  %v2419_v50 = vsub.f32 %v366_v1, %v2403_v59  ;;  %v2427_v29 = vsub.f32 %v367_v61, %v2413_v23  ;;  %v2434_v52 = vsub.f32 %v368_v18, %v2421_v10 }
  0x95   :  { %v485_v20 = vand.u32 4294901760, %v2395_v12  ;;  %v495_v40 = vand.u32 4294901760, %v2398_v38  ;;  %v505_v55 = vand.u32 4294901760, %v2401_v13  ;;  %v515_v37 = vand.u32 4294901760, %v2411_v35 }
  0x96   :  { %v475_v46 = vand.u32 4294901760, %v2406_v36  ;;  %v525_v49 = vand.u32 4294901760, %v2419_v50  ;;  %v535_v63 = vand.u32 4294901760, %v2427_v29  ;;  %v545_v6 = vand.u32 4294901760, %v2434_v52 }
  0x97   :  { %v486_v45 = vsub.f32 %v2395_v12, %v485_v20  ;;  %v496_v25 = vsub.f32 %v2398_v38, %v495_v40  ;;  %v506_v58 = vsub.f32 %v2401_v13, %v505_v55  ;;  %v516_v56 = vsub.f32 %v2411_v35, %v515_v37 }
  0x98   :  { %1655 = vmatprep.mubr.f32.mxu0 %v475_v46  ;;  %v476_v27 = vsub.f32 %v2406_v36, %v475_v46  ;;  %v526_v4 = vsub.f32 %v2419_v50, %v525_v49  ;;  %v536_v39 = vsub.f32 %v2427_v29, %v535_v63 }
  0x99   :  { %1656 = vmatmul.mubr.f32.vlgmr.msra.gmra.mrb[0].mxu0 %v485_v20  ;;  %v487_v43 = vand.u32 4294901760, %v486_v45  ;;  %v497_v33 = vand.u32 4294901760, %v496_v25  ;;  %v517_v21 = vand.u32 4294901760, %v516_v56 }
  0x9a   :  { %1886 = vmatpush3.bf16.msra.mxu0 %v2247_v8  ;;  %1658 = vmatprep.mubr.f32.mxu0 %v495_v40  ;;  %v477_v62 = vand.u32 4294901760, %v476_v27  ;;  %v507_v8 = vand.u32 4294901760, %v506_v58  ;;  %v537_v31 = vand.u32 4294901760, %v536_v39 }
  0x9b   :  { %1888 = vmatprep.subr.bf16.mxu0 %v2212_v57 }
  0x9c   :  { %1523 = vmatprep.mubr.f32.mxu1 %v477_v62 }
  0x9d   :  { %1524 = vmatmul.mubr.f32.vlgmr.msra.gmra.mrb[0].mxu1 %v487_v43  ;;  %1659 = vmatmul.mubr.f32.gmra.mrb[2].mxu0 %v505_v55 }
  0x9e   :  { %1790 = vmatpush3.bf16.msra.mxu1 %v2249_v9  ;;  %1890 = vmatpush3.bf16.msra.mxu0 %v2212_v57  ;;  %v527_v57 = vand.u32 4294901760, %v526_v4  ;;  %v546_v9 = vsub.f32 %v2434_v52, %v545_v6 }
  0x9f   :  { %1526 = vmatprep.mubr.f32.mxu1 %v497_v33  ;;  %1661 = vmatprep.mubr.f32.mxu0 %v515_v37 }
  0xa0   :  { %1792 = vmatprep.subr.bf16.mxu1 %v2229_v3  ;;  %1892 = vmatprep.subr.bf16.mxu0 %v2227_v2 }
  0xa1   :  { %1527 = vmatmul.mubr.f32.gmra.mrb[2].mxu1 %v507_v8  ;;  %1662 = vmatmul.mubr.f32.gmra.mrb[4].mxu0 %v525_v49 }
  0xa2   :  { %1794 = vmatpush3.bf16.msra.mxu1 %v2229_v3  ;;  %1894 = vmatpush3.bf16.msra.mxu0 %v2227_v2  ;;  %v547_v2 = vand.u32 4294901760, %v546_v9  ;;  %v2604_v3 = vld [vmem:[#allocation9_spill] sm:$0xff] }
  0xa3   :  { %1529 = vmatprep.mubr.f32.mxu1 %v517_v21  ;;  %1664 = vmatprep.mubr.f32.mxu0 %v535_v63 }
  0xa4   :  { %1796 = vmatprep.subr.bf16.mxu1 %v2253_v15  ;;  %1896 = vmatprep.subr.bf16.mxu0 %v2263_v19 }
  0xa5   :  { %1530 = vmatmul.mubr.f32.gmra.mrb[4].mxu1 %v527_v57  ;;  %1665 = vmatmul.mubr.f32.gmra.mrb[6].mxu0 %v545_v6 }
  0xa6   :  { %1798 = vmatpush3.bf16.msra.mxu1 %v2253_v15  ;;  %1898 = vmatpush3.bf16.msra.mxu0 %v2263_v19  ;;  %v2605_v15 = vld [vmem:[#allocation2_spill] sm:$0xff] }
  0xa7   :  { %1532 = vmatprep.mubr.f32.mxu1 %v537_v31  ;;  %1699 = vmatprep.mubr.f32.mxu0 %v2392_v17  ;;  %v2606_v19 = vld [vmem:[#allocation10_spill] sm:$0xff] }
  0xa8   :  { %1800 = vmatprep.subr.bf16.mxu1 %v2274_v51  ;;  %1900 = vmatprep.subr.bf16.mxu0 %v2269_v44 }
  0xa9   :  { %1533 = vmatmul.mubr.f32.gmra.mrb[6].mxu1 %v547_v2 }
  0xaa   :  { %1802 = vmatpush3.bf16.msra.mxu1 %v2274_v51  ;;  %1902 = vmatpush3.bf16.msra.mxu0 %v2269_v44  ;;  %v2607_v44 = vld [vmem:[#allocation3_spill] sm:$0xff]  ;;  %v2609_v51 = vld [vmem:[#allocation4_spill] sm:$0xff] }
  0xab   :  { %1567 = vmatprep.mubr.f32.mxu1 %v2392_v17  ;;  %1804 = vmatprep.subr.bf16.mxu1 %v2279_v60 }
  0xac   :  { %1904 = vmatprep.subr.bf16.mxu0 %v2287_v32 }
  0xae   :  { %1806 = vmatpush3.bf16.msra.mxu1 %v2279_v60  ;;  %1906 = vmatpush3.bf16.msra.mxu0 %v2287_v32  ;;  %v2610_v60 = vld [vmem:[#allocation12_spill] sm:$0xff]  ;;  %v2611_v32 = vld [vmem:[#allocation5_spill] sm:$0xff] }
  0xaf   :  { %1808 = vmatprep.subr.bf16.mxu1 %v2294_v34  ;;  %1908 = vmatprep.subr.bf16.mxu0 %v2289_v5 }
  0xb2   :  { %1810 = vmatpush3.bf16.msra.mxu1 %v2294_v34  ;;  %1910 = vmatpush3.bf16.msra.mxu0 %v2289_v5  ;;  %v2612_v5 = vld [vmem:[#allocation13_spill] sm:$0xff]  ;;  %v2613_v34 = vld [vmem:[#allocation6_spill] sm:$0xff] }
  0xb3   :  { %1812 = vmatprep.subr.bf16.mxu1 %v2299_v22  ;;  %1912 = vmatprep.subr.bf16.mxu0 %v2301_v24 }
  0xb6   :  { %1814 = vmatpush3.bf16.msra.mxu1 %v2299_v22  ;;  %1914 = vmatpush3.bf16.msra.mxu0 %v2301_v24  ;;  %v2614_v22 = vld [vmem:[#allocation14_spill] sm:$0xff]  ;;  %v2615_v24 = vld [vmem:[#allocation7_spill] sm:$0xff] }
  0xb7   :  { %1816 = vmatprep.subr.bf16.mxu1 %v2303_v28  ;;  %1916 = vmatprep.subr.bf16.mxu0 %v2069_v14 }
  0xb9   :  { %1700 = vmatmul.mubr.f32.vlgmr.msra.gmra.mrb[0].mxu0 %v2384_v7 }
  0xba   :  { %1818 = vmatpush3.bf16.msra.mxu1 %v2303_v28  ;;  %1702 = vmatprep.mubr.f32.mxu0 %v2386_v30  ;;  %v2616_v28 = vld [vmem:[#allocation15_spill] sm:$0xff] }
  0xbb   :  { %1918 = vmatpush3.bf16.msra.mxu0 %v2069_v14  ;;  %1820 = vmatprep.subr.bf16.mxu1 %v2604_v3  ;;  %v2608_v14 = vld [vmem:[#allocation11_spill] sm:$0xff] }
  0xbc   :  { %1920 = vmatprep.subr.bf16.mxu0 %v2605_v15 }
  0xbd   :  { %1568 = vmatmul.mubr.f32.vlgmr.msra.gmra.mrb[0].mxu1 %v2384_v7  ;;  %1703 = vmatmul.mubr.f32.gmra.mrb[2].mxu0 %v2388_v16 }
  0xbe   :  { %1570 = vmatprep.mubr.f32.mxu1 %v2386_v30  ;;  %1822 = vmatpush3.bf16.msra.mxu1 %v2604_v3 }
  0xbf   :  { %1705 = vmatprep.mubr.f32.mxu0 %v2390_v42  ;;  %1922 = vmatpush3.bf16.msra.mxu0 %v2605_v15 }
  0xc0   :  { %1824 = vmatprep.subr.bf16.mxu1 %v2606_v19  ;;  %1924 = vmatprep.subr.bf16.mxu0 %v2607_v44 }
  0xc1   :  { %1571 = vmatmul.mubr.f32.gmra.mrb[2].mxu1 %v2388_v16  ;;  %1706 = vmatmul.mubr.f32.gmra.mrb[4].mxu0 %v2403_v59 }
  0xc2   :  { %1573 = vmatprep.mubr.f32.mxu1 %v2390_v42  ;;  %1826 = vmatpush3.bf16.msra.mxu1 %v2606_v19 }
  0xc3   :  { %1708 = vmatprep.mubr.f32.mxu0 %v2413_v23  ;;  %1926 = vmatpush3.bf16.msra.mxu0 %v2607_v44 }
  0xc4   :  { %1828 = vmatprep.subr.bf16.mxu1 %v2608_v14  ;;  %1928 = vmatprep.subr.bf16.mxu0 %v2609_v51 }
  0xc5   :  { %1574 = vmatmul.mubr.f32.gmra.mrb[4].mxu1 %v2403_v59  ;;  %1709 = vmatmul.mubr.f32.gmra.mrb[6].mxu0 %v2421_v10 }
  0xc6   :  { %1576 = vmatprep.mubr.f32.mxu1 %v2413_v23  ;;  %1830 = vmatpush3.bf16.msra.mxu1 %v2608_v14 }
  0xc7   :  { %1930 = vmatpush3.bf16.msra.mxu0 %v2609_v51  ;;  %1743 = vmatprep.mubr.f32.mxu0 %v2392_v17 }
  0xc8   :  { %1832 = vmatprep.subr.bf16.mxu1 %v2610_v60  ;;  %1932 = vmatprep.subr.bf16.mxu0 %v2611_v32 }
  0xc9   :  { %1577 = vmatmul.mubr.f32.gmra.mrb[6].mxu1 %v2421_v10 }
  0xca   :  { %1834 = vmatpush3.bf16.msra.mxu1 %v2610_v60  ;;  %1611 = vmatprep.mubr.f32.mxu1 %v2406_v36 }
  0xcb   :  { %1934 = vmatpush3.bf16.msra.mxu0 %v2611_v32  ;;  %1836 = vmatprep.subr.bf16.mxu1 %v2612_v5 }
  0xcc   :  { %1936 = vmatprep.subr.bf16.mxu0 %v2613_v34 }
  0xce   :  { %1838 = vmatpush3.bf16.msra.mxu1 %v2612_v5 }
  0xcf   :  { %1938 = vmatpush3.bf16.msra.mxu0 %v2613_v34  ;;  %1840 = vmatprep.subr.bf16.mxu1 %v2614_v22 }
  0xd0   :  { %1940 = vmatprep.subr.bf16.mxu0 %v2615_v24 }
  0xd2   :  { %1842 = vmatpush3.bf16.msra.mxu1 %v2614_v22 }
  0xd3   :  { %1942 = vmatpush3.bf16.msra.mxu0 %v2615_v24  ;;  %1844 = vmatprep.subr.bf16.mxu1 %v2616_v28 }
  0xd4   :  { %1944 = vmatprep.subr.bf16.mxu0 %v2617_v41 }
  0xd6   :  { %1846 = vmatpush3.bf16.msra.mxu1 %v2616_v28 }
  0xd7   :  { %1946 = vmatpush3.bf16.msra.mxu0 %v2617_v41  ;;  %1848 = vmatprep.subr.bf16.mxu1 %v2618_v26 }
  0xda   :  { %1744 = vmatmul.mubr.f32.vlgmr.msra.gmra.mrb[0].mxu0 %v2384_v7  ;;  %1850 = vmatpush3.bf16.msra.mxu1 %v2618_v26 }
  0xdb   :  { %1746 = vmatprep.mubr.f32.mxu0 %v2386_v30 }
  0xdd   :  { %1612 = vmatmul.mubr.f32.vlgmr.msra.gmra.mrb[0].mxu1 %v2395_v12 }
  0xde   :  { %1747 = vmatmul.mubr.f32.gmra.mrb[2].mxu0 %v2388_v16  ;;  %1614 = vmatprep.mubr.f32.mxu1 %v2398_v38 }
  0xdf   :  { %1749 = vmatprep.mubr.f32.mxu0 %v2390_v42 }
  0xe1   :  { %1615 = vmatmul.mubr.f32.gmra.mrb[2].mxu1 %v2401_v13 }
  0xe2   :  { %1750 = vmatmul.mubr.f32.gmra.mrb[4].mxu0 %v2403_v59  ;;  %1617 = vmatprep.mubr.f32.mxu1 %v2411_v35 }
  0xe3   :  { %1752 = vmatprep.mubr.f32.mxu0 %v2413_v23 }
  0xe5   :  { %1618 = vmatmul.mubr.f32.gmra.mrb[4].mxu1 %v2419_v50 }
  0xe6   :  { %1753 = vmatmul.mubr.f32.gmra.mrb[6].mxu0 %v2421_v10  ;;  %1620 = vmatprep.mubr.f32.mxu1 %v2427_v29 }
  0xe9   :  { %1621 = vmatmul.mubr.f32.gmra.mrb[6].mxu1 %v2434_v52 }
 0x1ad   :  { %v1745_v48 = vpop.f32.mrb[0].mxu0 }
 0x1ae   :  { %v1288_v54 = vpop.f32.mrb[1].mxu0 }
 0x1b0   :  { %v1613_v11 = vpop.f32.mrb[0].mxu1 }
 0x1b1   :  { %v1947_v0 = vadd.f32 %v1613_v11, %v1346_v47  ;;  %v1748_v53 = vpop.f32.mrb[2].mxu0  ;;  %v846_v1 = vpop.f32.mrb[1].mxu1 }
 0x1b2   :  { %v1949_v61 = vadd.f32 %v1346_v47, %v846_v1  ;;  %v1300_v7 = vpop.f32.mrb[3].mxu0 }
 0x1b3   :  { %v1948_v30 = vadd.f32 %v1947_v0, %v1745_v48 }
 0x1b4   :  { %v1950_v16 = vadd.f32 %v1949_v61, %v1288_v54  ;;  %v1616_v42 = vpop.f32.mrb[2].mxu1 }
 0x1b5   :  { %1335 = vst [vmem:[%s2566_s5 + $0x8] sm:$0xff] %v1948_v30  ;;  %v1951_v17 = vadd.f32 %v1616_v42, %v1346_v47  ;;  %v1751_v18 = vpop.f32.mrb[4].mxu0  ;;  %v860_v12 = vpop.f32.mrb[3].mxu1 }
 0x1b6   :  { %1334 = vst [vmem:[%s2566_s5] sm:$0xff] %v1950_v16  ;;  %v1953_v38 = vadd.f32 %v1346_v47, %v860_v12  ;;  %v1312_v13 = vpop.f32.mrb[5].mxu0 }
 0x1b7   :  { %v1952_v59 = vadd.f32 %v1951_v17, %v1748_v53 }
 0x1b8   :  { %v1954_v36 = vadd.f32 %v1953_v38, %v1300_v7  ;;  %v1619_v20 = vpop.f32.mrb[4].mxu1 }
 0x1b9   :  { %1337 = vst [vmem:[%s2566_s5 + $0x18] sm:$0xff] %v1952_v59  ;;  %v1955_v40 = vadd.f32 %v1619_v20, %v1346_v47  ;;  %v1754_v35 = vpop.f32.mrb[6].mxu0  ;;  %v874_v23 = vpop.f32.mrb[5].mxu1 }
 0x1ba   :  { %1336 = vst [vmem:[%s2566_s5 + $0x10] sm:$0xff] %v1954_v36  ;;  %v1957_v46 = vadd.f32 %v1346_v47, %v874_v23  ;;  %v1324_v45 = vpop.f32.mrb[7].mxu0 }
 0x1bb   :  { %v1956_v55 = vadd.f32 %v1955_v40, %v1751_v18 }
 0x1bc   :  { %v1958_v50 = vadd.f32 %v1957_v46, %v1312_v13  ;;  %v1622_v10 = vpop.f32.mrb[6].mxu1 }
 0x1bd   :  { %1339 = vst [vmem:[%s2566_s5 + $0x28] sm:$0xff] %v1956_v55  ;;  %v1959_v27 = vadd.f32 %v1622_v10, %v1346_v47  ;;  %v888_v43 = vpop.f32.mrb[7].mxu1 }
 0x1be   :  { %1338 = vst [vmem:[%s2566_s5 + $0x20] sm:$0xff] %v1958_v50  ;;  %v1961_v25 = vadd.f32 %v1346_v47, %v888_v43 }
 0x1bf   :  { %v1960_v37 = vadd.f32 %v1959_v27, %v1754_v35 }
 0x1c0   :  { %v1962_v29 = vadd.f32 %v1961_v25, %v1324_v45 }
 0x1c1   :  { %1341 = vst [vmem:[%s2566_s5 + $0x38] sm:$0xff] %v1960_v37 }
 0x1c2   :  { %1340 = vst [vmem:[%s2566_s5 + $0x30] sm:$0xff] %v1962_v29 }

</bundles_post_ra>
